<compile_context>
chip_gen: v7x
topology: tpu7x:2x2x1
jax: 0.10.0
libtpu: 0.0.40
codegen_flags: <defaults>
</compile_context>

<pallas_src>
import jax
import jax.numpy as jnp
from jax.experimental import pallas as pl
from jax.experimental.pallas import tpu as pltpu


def _round_up(x, m):
    return (x + m - 1) // m * m


def _pad_cols(a, target):
    pad = target - a.shape[-1]
    return a if pad == 0 else jnp.pad(a, ((0, 0), (0, pad)))


def _pad_rows(a, target):
    pad = target - a.shape[0]
    return a if pad == 0 else jnp.pad(a, ((0, pad), (0, 0)))


def _autoencoder_kernel(x_ref,
                        w1_ref, b1_ref, w2_ref, b2_ref,
                        w3_ref, b3_ref, w4_ref, b4_ref,
                        xhat_ref, z_ref):
    cd = w1_ref.dtype                      # compute dtype (bf16 or f32)
    x = x_ref[...].astype(cd)              # cast on the VPU, not in the wrapper

    # encoder: Linear(input, hidden) -> ReLU -> Linear(hidden, latent)
    h = jnp.dot(x, w1_ref[...], preferred_element_type=jnp.float32) + b1_ref[...]
    h = jnp.maximum(h, 0.0).astype(cd)
    z = jnp.dot(h, w2_ref[...], preferred_element_type=jnp.float32) + b2_ref[...]
    z_ref[...] = z.astype(z_ref.dtype)

    # decoder: Linear(latent, hidden) -> ReLU -> Linear(hidden, input)
    # NOTE: the decoder consumes the f32 accumulator z (identical to the stored
    # z for f32 outputs; mirrors the PyTorch module where z stays f32).
    g = jnp.dot(z.astype(cd), w3_ref[...],
                preferred_element_type=jnp.float32) + b3_ref[...]
    g = jnp.maximum(g, 0.0).astype(cd)
    x_hat = jnp.dot(g, w4_ref[...], preferred_element_type=jnp.float32) + b4_ref[...]
    xhat_ref[...] = x_hat.astype(xhat_ref.dtype)


def prepare_params(params, *, compute_dtype=jnp.bfloat16):
    """Cast/pad the weights once (at init time, NOT per forward call).

    hidden_dim is zero-padded to a multiple of 128 so the h/g intermediates are
    lane-dense; the padded columns are zero through ReLU and contribute nothing
    to the following matmuls, so results are unchanged.
    """
    w1, b1, w2, b2, w3, b3, w4, b4 = params
    hidden_dim = w1.shape[1]
    hp = _round_up(hidden_dim, 128)
    cd = compute_dtype
    return (
        _pad_cols(w1, hp).astype(cd),               # (input, hp)
        _pad_cols(b1.astype(jnp.float32), hp),      # (1, hp)
        _pad_rows(w2, hp).astype(cd),               # (hp, latent)
        b2.astype(jnp.float32),                     # (1, latent)
        _pad_cols(w3, hp).astype(cd),               # (latent, hp)
        _pad_cols(b3.astype(jnp.float32), hp),      # (1, hp)
        _pad_rows(w4, hp).astype(cd),               # (hp, input)
        b4.astype(jnp.float32),                     # (1, input)
    )


_DEFAULT_VMEM = 64 * 1024 * 1024   # conservative default (v7x per-TC VMEM)


def _vmem_capacity_bytes():
    try:
        return int(pltpu.get_tpu_info().vmem_capacity_bytes)
    except Exception:
        return _DEFAULT_VMEM


def keypg_autoencoder(x, prepared, *, batch_tile=None, weight_single_buffer=True):
    """Forward pass. `prepared` = prepare_params(raw_params). Returns (x_hat, z)."""
    w1c, b1f, w2c, b2f, w3c, b3f, w4c, b4f = prepared
    B, input_dim = x.shape
    assert w1c.shape[0] == input_dim and w4c.shape[1] == input_dim
    hidden_pad = w1c.shape[1]
    latent_dim = w2c.shape[1]
    out_dtype = x.dtype

    x_isz = jnp.dtype(x.dtype).itemsize
    o_isz = jnp.dtype(out_dtype).itemsize
    c_isz = jnp.dtype(w1c.dtype).itemsize
    weight_bytes = sum(int(a.size) * jnp.dtype(a.dtype).itemsize for a in prepared)
    wbuf = 1 if weight_single_buffer else 2
    vmem_cap = _vmem_capacity_bytes()

    # ---- batch tiling (generation-aware: sized off this chip's VMEM) --------
    # per-row VMEM cost: double-buffered x / x_hat / z tiles + f32 accumulators
    # and compute-dtype copies of the h/g intermediates.
    per_row = (2 * input_dim * x_isz
               + 2 * (input_dim + latent_dim) * o_isz
               + 2 * hidden_pad * (4 + c_isz)
               + (input_dim + latent_dim) * 4)
    if batch_tile is None:
        budget = int(0.5 * vmem_cap) - wbuf * weight_bytes
        tb = 8
        for cand in (1024, 512, 256, 128, 64, 32, 16, 8):
            if cand * per_row <= budget:
                tb = cand
                break
        tb = min(tb, _round_up(B, 8))
    else:
        tb = batch_tile
    assert tb % 8 == 0, "batch tile must be a multiple of 8 (f32 sublane tiling)"

    # Ragged last tile: Pallas pads the read and clips the writeback, so no
    # wrapper-side jnp.pad over x and no output slice copy are needed.
    steps = pl.cdiv(B, tb)
    grid = (steps,)

    # ---- VMEM limit & scheduling hints ---------------------------------------
    est = wbuf * weight_bytes + tb * per_row
    vmem_limit = min(max(int(est * 1.5), 32 * 1024 * 1024), int(0.9 * vmem_cap))

    flops = 2 * B * hidden_pad * (2 * input_dim + 2 * latent_dim)
    bytes_accessed = int(B * input_dim * x_isz
                         + B * (input_dim + latent_dim) * o_isz
                         + weight_bytes)
    cost = pl.CostEstimate(flops=int(flops), transcendentals=0,
                           bytes_accessed=bytes_accessed)

    out_shapes = (
        jax.ShapeDtypeStruct((B, input_dim), out_dtype),    # x_hat
        jax.ShapeDtypeStruct((B, latent_dim), out_dtype),   # z
    )

    def _build(buffered_weights):
        def const_spec(shape):
            # weights/biases: same block every grid step -> VMEM-resident;
            # single-buffered to halve their VMEM footprint.
            if buffered_weights:
                return pl.BlockSpec(shape, lambda i: (0, 0),
                                    pipeline_mode=pl.Buffered(1))
            return pl.BlockSpec(shape, lambda i: (0, 0))

        return pl.pallas_call(
            _autoencoder_kernel,
            out_shape=out_shapes,
            grid_spec=pltpu.PrefetchScalarGridSpec(
                num_scalar_prefetch=0,
                grid=grid,
                in_specs=[
                    pl.BlockSpec((tb, input_dim), lambda i: (i, 0)),   # x tile
                    const_spec((input_dim, hidden_pad)),               # w1
                    const_spec((1, hidden_pad)),                       # b1
                    const_spec((hidden_pad, latent_dim)),              # w2
                    const_spec((1, latent_dim)),                       # b2
                    const_spec((latent_dim, hidden_pad)),              # w3
                    const_spec((1, hidden_pad)),                       # b3
                    const_spec((hidden_pad, input_dim)),               # w4
                    const_spec((1, input_dim)),                        # b4
                ],
                out_specs=[
                    pl.BlockSpec((tb, input_dim), lambda i: (i, 0)),    # x_hat
                    pl.BlockSpec((tb, latent_dim), lambda i: (i, 0)),   # z
                ],
            ),
            compiler_params=pltpu.CompilerParams(
                dimension_semantics=("parallel",),
                vmem_limit_bytes=vmem_limit),
            cost_estimate=cost,
        )

    args = (x, w1c, b1f, w2c, b2f, w3c, b3f, w4c, b4f)
    if weight_single_buffer:
        try:
            return _build(True)(*args)
        except Exception:
            # TODO(synk): remove fallback once pl.Buffered(1) is verified on
            # every target jax build; it only exists to guarantee a clean run.
            return _build(False)(*args)
    return _build(False)(*args)


def init_params(key, input_dim, hidden_dim, latent_dim, dtype=jnp.float32):
    """Deterministic synthetic parameters (PyTorch-style uniform fan-in init)."""
    dims = [(input_dim, hidden_dim), (hidden_dim, latent_dim),
            (latent_dim, hidden_dim), (hidden_dim, input_dim)]
    params = []
    keys = jax.random.split(key, 2 * len(dims))
    for li, (fan_in, fan_out) in enumerate(dims):
        bound = 1.0 / jnp.sqrt(fan_in)
        w = jax.random.uniform(keys[2 * li], (fan_in, fan_out),
                               minval=-bound, maxval=bound, dtype=dtype)
        b = jax.random.uniform(keys[2 * li + 1], (1, fan_out),
                               minval=-bound, maxval=bound, dtype=dtype)
        params += [w, b]
    return tuple(params)


def reference_forward(x, params):
    w1, b1, w2, b2, w3, b3, w4, b4 = params
    h = jnp.maximum(x @ w1 + b1, 0.0)
    z = h @ w2 + b2
    g = jnp.maximum(z @ w3 + b3, 0.0)
    x_hat = g @ w4 + b4
    return x_hat, z


if __name__ == "__main__":
    input_dim, hidden_dim, latent_dim = 32, 64, 16
    batch = 8

    key = jax.random.PRNGKey(0)
    k_params, k_x, k_x2 = jax.random.split(key, 3)
    params = init_params(k_params, input_dim, hidden_dim, latent_dim)
    x = jax.random.normal(k_x, (batch, input_dim), dtype=jnp.float32)

    # prepare (cast / pad) the weights ONCE -- not per forward call
    prepared_bf16 = prepare_params(params, compute_dtype=jnp.bfloat16)
    prepared_f32 = prepare_params(params, compute_dtype=jnp.float32)

    # optimized default path (bf16 matmul operands, f32 accumulation)
    x_hat, z = keypg_autoencoder(x, prepared_bf16)
    jax.block_until_ready((x_hat, z))

    # strict-precision path (f32 compute) for a tight correctness check
    x_hat32, z32 = keypg_autoencoder(x, prepared_f32)
    jax.block_until_ready((x_hat32, z32))

    x_hat_ref, z_ref = reference_forward(x, params)
    assert x_hat.shape == (batch, input_dim) and z.shape == (batch, latent_dim)
    assert jnp.allclose(x_hat32, x_hat_ref, atol=1e-5, rtol=1e-5)
    assert jnp.allclose(z32, z_ref, atol=1e-5, rtol=1e-5)
    assert jnp.allclose(x_hat, x_hat_ref, atol=5e-2, rtol=5e-2)
    assert jnp.allclose(z, z_ref, atol=5e-2, rtol=5e-2)

    # ragged batch (not a multiple of the tile, not a multiple of 8) exercises
    # the cdiv grid + clipped last tile without any wrapper-side padding
    x2 = jax.random.normal(k_x2, (50, input_dim), dtype=jnp.float32)
    x_hat2, z2 = keypg_autoencoder(x2, prepared_f32, batch_tile=16)
    jax.block_until_ready((x_hat2, z2))
    x_hat2_ref, z2_ref = reference_forward(x2, params)
    assert x_hat2.shape == (50, input_dim) and z2.shape == (50, latent_dim)
    assert jnp.allclose(x_hat2, x_hat2_ref, atol=1e-5, rtol=1e-5)
    assert jnp.allclose(z2, z2_ref, atol=1e-5, rtol=1e-5)

    print("KERNEL_OK")
</pallas_src>

<mosaic_0001>
module attributes {stable_mosaic.version = 11 : i64} {
  func.func @_autoencoder_kernel(%arg0: i32, %arg1: memref<8x32xf32, #tpu.memory_space<vmem>>, %arg2: memref<32x128xbf16, #tpu.memory_space<vmem>>, %arg3: memref<1x128xf32, #tpu.memory_space<vmem>>, %arg4: memref<128x16xbf16, #tpu.memory_space<vmem>>, %arg5: memref<1x16xf32, #tpu.memory_space<vmem>>, %arg6: memref<16x128xbf16, #tpu.memory_space<vmem>>, %arg7: memref<1x128xf32, #tpu.memory_space<vmem>>, %arg8: memref<128x32xbf16, #tpu.memory_space<vmem>>, %arg9: memref<1x32xf32, #tpu.memory_space<vmem>>, %arg10: memref<8x32xf32, #tpu.memory_space<vmem>>, %arg11: memref<8x16xf32, #tpu.memory_space<vmem>>) attributes {dimension_semantics = [#tpu.dimension_semantics<parallel>], iteration_bounds = array<i64: 1>, scalar_prefetch = 0 : i64, scratch_operands = 0 : i64, tpu.core_type = #tpu.core_type<tc>, window_params = [{transform_indices = @transform_0, window_bounds = array<i64: 8, 32>}, {pipeline_mode = #tpu.pipeline_mode<synchronous>, transform_indices = @transform_1, window_bounds = array<i64: 32, 128>}, {pipeline_mode = #tpu.pipeline_mode<synchronous>, transform_indices = @transform_2, window_bounds = array<i64: 1, 128>}, {pipeline_mode = #tpu.pipeline_mode<synchronous>, transform_indices = @transform_3, window_bounds = array<i64: 128, 16>}, {pipeline_mode = #tpu.pipeline_mode<synchronous>, transform_indices = @transform_4, window_bounds = array<i64: 1, 16>}, {pipeline_mode = #tpu.pipeline_mode<synchronous>, transform_indices = @transform_5, window_bounds = array<i64: 16, 128>}, {pipeline_mode = #tpu.pipeline_mode<synchronous>, transform_indices = @transform_6, window_bounds = array<i64: 1, 128>}, {pipeline_mode = #tpu.pipeline_mode<synchronous>, transform_indices = @transform_7, window_bounds = array<i64: 128, 32>}, {pipeline_mode = #tpu.pipeline_mode<synchronous>, transform_indices = @transform_8, window_bounds = array<i64: 1, 32>}, {transform_indices = @transform_9, window_bounds = array<i64: 8, 32>}, {transform_indices = @transform_10, window_bounds = array<i64: 8, 16>}]} {
    %c0 = arith.constant 0 : index
    %c0_0 = arith.constant 0 : index
    %0 = vector.load %arg1[%c0, %c0_0] : memref<8x32xf32, #tpu.memory_space<vmem>>, vector<8x32xf32>
    %1 = arith.truncf %0 : vector<8x32xf32> to vector<8x32xbf16>
    %c0_1 = arith.constant 0 : index
    %c0_2 = arith.constant 0 : index
    %2 = vector.load %arg2[%c0_1, %c0_2] : memref<32x128xbf16, #tpu.memory_space<vmem>>, vector<32x128xbf16>
    %cst = arith.constant dense<0.000000e+00> : vector<8x128xf32>
    %3 = tpu.matmul %1, %2, %cst {dimension_numbers = #tpu.dot_dimension_numbers<[1], [0], [0], [1], [0, 0, 1, 1], [], []>} : vector<8x32xbf16>, vector<32x128xbf16>, vector<8x128xf32> -> vector<8x128xf32>
    %c0_3 = arith.constant 0 : index
    %c0_4 = arith.constant 0 : index
    %4 = vector.load %arg3[%c0_3, %c0_4] : memref<1x128xf32, #tpu.memory_space<vmem>>, vector<1x128xf32>
    %5 = vector.broadcast %4 : vector<1x128xf32> to vector<8x128xf32>
    %6 = arith.addf %3, %5 : vector<8x128xf32>
    %cst_5 = arith.constant 0.000000e+00 : f32
    %7 = vector.broadcast %cst_5 : f32 to vector<8x128xf32>
    %8 = arith.maximumf %6, %7 : vector<8x128xf32>
    %9 = arith.truncf %8 : vector<8x128xf32> to vector<8x128xbf16>
    %c0_6 = arith.constant 0 : index
    %c0_7 = arith.constant 0 : index
    %10 = vector.load %arg4[%c0_6, %c0_7] : memref<128x16xbf16, #tpu.memory_space<vmem>>, vector<128x16xbf16>
    %cst_8 = arith.constant dense<0.000000e+00> : vector<8x16xf32>
    %11 = tpu.matmul %9, %10, %cst_8 {dimension_numbers = #tpu.dot_dimension_numbers<[1], [0], [0], [1], [0, 0, 1, 1], [], []>} : vector<8x128xbf16>, vector<128x16xbf16>, vector<8x16xf32> -> vector<8x16xf32>
    %c0_9 = arith.constant 0 : index
    %c0_10 = arith.constant 0 : index
    %12 = vector.load %arg5[%c0_9, %c0_10] : memref<1x16xf32, #tpu.memory_space<vmem>>, vector<1x16xf32>
    %13 = vector.broadcast %12 : vector<1x16xf32> to vector<8x16xf32>
    %14 = arith.addf %11, %13 : vector<8x16xf32>
    %c0_11 = arith.constant 0 : index
    %c0_12 = arith.constant 0 : index
    %15 = vector.load %arg11[%c0_11, %c0_12] : memref<8x16xf32, #tpu.memory_space<vmem>>, vector<8x16xf32>
    tpu.vector_store %arg11[%c0_11, %c0_12], %14 {strides = array<i32>} : memref<8x16xf32, #tpu.memory_space<vmem>>, vector<8x16xf32>,
    %16 = arith.truncf %14 : vector<8x16xf32> to vector<8x16xbf16>
    %c0_13 = arith.constant 0 : index
    %c0_14 = arith.constant 0 : index
    %17 = vector.load %arg6[%c0_13, %c0_14] : memref<16x128xbf16, #tpu.memory_space<vmem>>, vector<16x128xbf16>
    %cst_15 = arith.constant dense<0.000000e+00> : vector<8x128xf32>
    %18 = tpu.matmul %16, %17, %cst_15 {dimension_numbers = #tpu.dot_dimension_numbers<[1], [0], [0], [1], [0, 0, 1, 1], [], []>} : vector<8x16xbf16>, vector<16x128xbf16>, vector<8x128xf32> -> vector<8x128xf32>
    %c0_16 = arith.constant 0 : index
    %c0_17 = arith.constant 0 : index
    %19 = vector.load %arg7[%c0_16, %c0_17] : memref<1x128xf32, #tpu.memory_space<vmem>>, vector<1x128xf32>
    %20 = vector.broadcast %19 : vector<1x128xf32> to vector<8x128xf32>
    %21 = arith.addf %18, %20 : vector<8x128xf32>
    %cst_18 = arith.constant 0.000000e+00 : f32
    %22 = vector.broadcast %cst_18 : f32 to vector<8x128xf32>
    %23 = arith.maximumf %21, %22 : vector<8x128xf32>
    %24 = arith.truncf %23 : vector<8x128xf32> to vector<8x128xbf16>
    %c0_19 = arith.constant 0 : index
    %c0_20 = arith.constant 0 : index
    %25 = vector.load %arg8[%c0_19, %c0_20] : memref<128x32xbf16, #tpu.memory_space<vmem>>, vector<128x32xbf16>
    %cst_21 = arith.constant dense<0.000000e+00> : vector<8x32xf32>
    %26 = tpu.matmul %24, %25, %cst_21 {dimension_numbers = #tpu.dot_dimension_numbers<[1], [0], [0], [1], [0, 0, 1, 1], [], []>} : vector<8x128xbf16>, vector<128x32xbf16>, vector<8x32xf32> -> vector<8x32xf32>
    %c0_22 = arith.constant 0 : index
    %c0_23 = arith.constant 0 : index
    %27 = vector.load %arg9[%c0_22, %c0_23] : memref<1x32xf32, #tpu.memory_space<vmem>>, vector<1x32xf32>
    %28 = vector.broadcast %27 : vector<1x32xf32> to vector<8x32xf32>
    %29 = arith.addf %26, %28 : vector<8x32xf32>
    %c0_24 = arith.constant 0 : index
    %c0_25 = arith.constant 0 : index
    %30 = vector.load %arg10[%c0_24, %c0_25] : memref<8x32xf32, #tpu.memory_space<vmem>>, vector<8x32xf32>
    tpu.vector_store %arg10[%c0_24, %c0_25], %29 {strides = array<i32>} : memref<8x32xf32, #tpu.memory_space<vmem>>, vector<8x32xf32>,
    return
  }
  func.func @transform_0(%arg0: i32) -> (i32, i32) {
    %c0_i32 = arith.constant 0 : i32
    %c0_i32_0 = arith.constant 0 : i32
    return %arg0, %c0_i32 : i32, i32
  }
  func.func @transform_1(%arg0: i32) -> (i32, i32) {
    %c0_i32 = arith.constant 0 : i32
    %c0_i32_0 = arith.constant 0 : i32
    %c0_i32_1 = arith.constant 0 : i32
    return %c0_i32, %c0_i32_0 : i32, i32
  }
  func.func @transform_2(%arg0: i32) -> (i32, i32) {
    %c0_i32 = arith.constant 0 : i32
    %c0_i32_0 = arith.constant 0 : i32
    %c0_i32_1 = arith.constant 0 : i32
    return %c0_i32, %c0_i32_0 : i32, i32
  }
  func.func @transform_3(%arg0: i32) -> (i32, i32) {
    %c0_i32 = arith.constant 0 : i32
    %c0_i32_0 = arith.constant 0 : i32
    %c0_i32_1 = arith.constant 0 : i32
    return %c0_i32, %c0_i32_0 : i32, i32
  }
  func.func @transform_4(%arg0: i32) -> (i32, i32) {
    %c0_i32 = arith.constant 0 : i32
    %c0_i32_0 = arith.constant 0 : i32
    %c0_i32_1 = arith.constant 0 : i32
    return %c0_i32, %c0_i32_0 : i32, i32
  }
  func.func @transform_5(%arg0: i32) -> (i32, i32) {
    %c0_i32 = arith.constant 0 : i32
    %c0_i32_0 = arith.constant 0 : i32
    %c0_i32_1 = arith.constant 0 : i32
    return %c0_i32, %c0_i32_0 : i32, i32
  }
  func.func @transform_6(%arg0: i32) -> (i32, i32) {
    %c0_i32 = arith.constant 0 : i32
    %c0_i32_0 = arith.constant 0 : i32
    %c0_i32_1 = arith.constant 0 : i32
    return %c0_i32, %c0_i32_0 : i32, i32
  }
  func.func @transform_7(%arg0: i32) -> (i32, i32) {
    %c0_i32 = arith.constant 0 : i32
    %c0_i32_0 = arith.constant 0 : i32
    %c0_i32_1 = arith.constant 0 : i32
    return %c0_i32, %c0_i32_0 : i32, i32
  }
  func.func @transform_8(%arg0: i32) -> (i32, i32) {
    %c0_i32 = arith.constant 0 : i32
    %c0_i32_0 = arith.constant 0 : i32
    %c0_i32_1 = arith.constant 0 : i32
    return %c0_i32, %c0_i32_0 : i32, i32
  }
  func.func @transform_9(%arg0: i32) -> (i32, i32) {
    %c0_i32 = arith.constant 0 : i32
    %c0_i32_0 = arith.constant 0 : i32
    return %arg0, %c0_i32 : i32, i32
  }
  func.func @transform_10(%arg0: i32) -> (i32, i32) {
    %c0_i32 = arith.constant 0 : i32
    %c0_i32_0 = arith.constant 0 : i32
    return %arg0, %c0_i32 : i32, i32
  }
}

module attributes {stable_mosaic.version = 11 : i64} {
  func.func @_autoencoder_kernel(%arg0: i32, %arg1: memref<8x32xf32, #tpu.memory_space<vmem>>, %arg2: memref<32x128xbf16, #tpu.memory_space<vmem>>, %arg3: memref<1x128xf32, #tpu.memory_space<vmem>>, %arg4: memref<128x16xbf16, #tpu.memory_space<vmem>>, %arg5: memref<1x16xf32, #tpu.memory_space<vmem>>, %arg6: memref<16x128xbf16, #tpu.memory_space<vmem>>, %arg7: memref<1x128xf32, #tpu.memory_space<vmem>>, %arg8: memref<128x32xbf16, #tpu.memory_space<vmem>>, %arg9: memref<1x32xf32, #tpu.memory_space<vmem>>, %arg10: memref<8x32xf32, #tpu.memory_space<vmem>>, %arg11: memref<8x16xf32, #tpu.memory_space<vmem>>) attributes {dimension_semantics = [#tpu.dimension_semantics<parallel>], iteration_bounds = array<i64: 1>, scalar_prefetch = 0 : i64, scratch_operands = 0 : i64, tpu.core_type = #tpu.core_type<tc>, window_params = [{transform_indices = @transform_0, window_bounds = array<i64: 8, 32>}, {pipeline_mode = #tpu.pipeline_mode<synchronous>, transform_indices = @transform_1, window_bounds = array<i64: 32, 128>}, {pipeline_mode = #tpu.pipeline_mode<synchronous>, transform_indices = @transform_2, window_bounds = array<i64: 1, 128>}, {pipeline_mode = #tpu.pipeline_mode<synchronous>, transform_indices = @transform_3, window_bounds = array<i64: 128, 16>}, {pipeline_mode = #tpu.pipeline_mode<synchronous>, transform_indices = @transform_4, window_bounds = array<i64: 1, 16>}, {pipeline_mode = #tpu.pipeline_mode<synchronous>, transform_indices = @transform_5, window_bounds = array<i64: 16, 128>}, {pipeline_mode = #tpu.pipeline_mode<synchronous>, transform_indices = @transform_6, window_bounds = array<i64: 1, 128>}, {pipeline_mode = #tpu.pipeline_mode<synchronous>, transform_indices = @transform_7, window_bounds = array<i64: 128, 32>}, {pipeline_mode = #tpu.pipeline_mode<synchronous>, transform_indices = @transform_8, window_bounds = array<i64: 1, 32>}, {transform_indices = @transform_9, window_bounds = array<i64: 8, 32>}, {transform_indices = @transform_10, window_bounds = array<i64: 8, 16>}]} {
    %c0 = arith.constant 0 : index
    %c0_0 = arith.constant 0 : index
    %0 = vector.load %arg1[%c0, %c0_0] : memref<8x32xf32, #tpu.memory_space<vmem>>, vector<8x32xf32>
    %1 = arith.truncf %0 : vector<8x32xf32> to vector<8x32xbf16>
    %c0_1 = arith.constant 0 : index
    %c0_2 = arith.constant 0 : index
    %2 = vector.load %arg2[%c0_1, %c0_2] : memref<32x128xbf16, #tpu.memory_space<vmem>>, vector<32x128xbf16>
    %cst = arith.constant dense<0.000000e+00> : vector<8x128xf32>
    %3 = tpu.matmul %1, %2, %cst {dimension_numbers = #tpu.dot_dimension_numbers<[1], [0], [0], [1], [0, 0, 1, 1], [], []>} : vector<8x32xbf16>, vector<32x128xbf16>, vector<8x128xf32> -> vector<8x128xf32>
    %c0_3 = arith.constant 0 : index
    %c0_4 = arith.constant 0 : index
    %4 = vector.load %arg3[%c0_3, %c0_4] : memref<1x128xf32, #tpu.memory_space<vmem>>, vector<1x128xf32>
    %5 = vector.broadcast %4 : vector<1x128xf32> to vector<8x128xf32>
    %6 = arith.addf %3, %5 : vector<8x128xf32>
    %cst_5 = arith.constant 0.000000e+00 : f32
    %7 = vector.broadcast %cst_5 : f32 to vector<8x128xf32>
    %8 = arith.maximumf %6, %7 : vector<8x128xf32>
    %9 = arith.truncf %8 : vector<8x128xf32> to vector<8x128xbf16>
    %c0_6 = arith.constant 0 : index
    %c0_7 = arith.constant 0 : index
    %10 = vector.load %arg4[%c0_6, %c0_7] : memref<128x16xbf16, #tpu.memory_space<vmem>>, vector<128x16xbf16>
    %cst_8 = arith.constant dense<0.000000e+00> : vector<8x16xf32>
    %11 = tpu.matmul %9, %10, %cst_8 {dimension_numbers = #tpu.dot_dimension_numbers<[1], [0], [0], [1], [0, 0, 1, 1], [], []>} : vector<8x128xbf16>, vector<128x16xbf16>, vector<8x16xf32> -> vector<8x16xf32>
    %c0_9 = arith.constant 0 : index
    %c0_10 = arith.constant 0 : index
    %12 = vector.load %arg5[%c0_9, %c0_10] : memref<1x16xf32, #tpu.memory_space<vmem>>, vector<1x16xf32>
    %13 = vector.broadcast %12 : vector<1x16xf32> to vector<8x16xf32>
    %14 = arith.addf %11, %13 : vector<8x16xf32>
    %c0_11 = arith.constant 0 : index
    %c0_12 = arith.constant 0 : index
    %15 = vector.load %arg11[%c0_11, %c0_12] : memref<8x16xf32, #tpu.memory_space<vmem>>, vector<8x16xf32>
    tpu.vector_store %arg11[%c0_11, %c0_12], %14 {strides = array<i32>} : memref<8x16xf32, #tpu.memory_space<vmem>>, vector<8x16xf32>,
    %16 = arith.truncf %14 : vector<8x16xf32> to vector<8x16xbf16>
    %c0_13 = arith.constant 0 : index
    %c0_14 = arith.constant 0 : index
    %17 = vector.load %arg6[%c0_13, %c0_14] : memref<16x128xbf16, #tpu.memory_space<vmem>>, vector<16x128xbf16>
    %cst_15 = arith.constant dense<0.000000e+00> : vector<8x128xf32>
    %18 = tpu.matmul %16, %17, %cst_15 {dimension_numbers = #tpu.dot_dimension_numbers<[1], [0], [0], [1], [0, 0, 1, 1], [], []>} : vector<8x16xbf16>, vector<16x128xbf16>, vector<8x128xf32> -> vector<8x128xf32>
    %c0_16 = arith.constant 0 : index
    %c0_17 = arith.constant 0 : index
    %19 = vector.load %arg7[%c0_16, %c0_17] : memref<1x128xf32, #tpu.memory_space<vmem>>, vector<1x128xf32>
    %20 = vector.broadcast %19 : vector<1x128xf32> to vector<8x128xf32>
    %21 = arith.addf %18, %20 : vector<8x128xf32>
    %cst_18 = arith.constant 0.000000e+00 : f32
    %22 = vector.broadcast %cst_18 : f32 to vector<8x128xf32>
    %23 = arith.maximumf %21, %22 : vector<8x128xf32>
    %24 = arith.truncf %23 : vector<8x128xf32> to vector<8x128xbf16>
    %c0_19 = arith.constant 0 : index
    %c0_20 = arith.constant 0 : index
    %25 = vector.load %arg8[%c0_19, %c0_20] : memref<128x32xbf16, #tpu.memory_space<vmem>>, vector<128x32xbf16>
    %cst_21 = arith.constant dense<0.000000e+00> : vector<8x32xf32>
    %26 = tpu.matmul %24, %25, %cst_21 {dimension_numbers = #tpu.dot_dimension_numbers<[1], [0], [0], [1], [0, 0, 1, 1], [], []>} : vector<8x128xbf16>, vector<128x32xbf16>, vector<8x32xf32> -> vector<8x32xf32>
    %c0_22 = arith.constant 0 : index
    %c0_23 = arith.constant 0 : index
    %27 = vector.load %arg9[%c0_22, %c0_23] : memref<1x32xf32, #tpu.memory_space<vmem>>, vector<1x32xf32>
    %28 = vector.broadcast %27 : vector<1x32xf32> to vector<8x32xf32>
    %29 = arith.addf %26, %28 : vector<8x32xf32>
    %c0_24 = arith.constant 0 : index
    %c0_25 = arith.constant 0 : index
    %30 = vector.load %arg10[%c0_24, %c0_25] : memref<8x32xf32, #tpu.memory_space<vmem>>, vector<8x32xf32>
    tpu.vector_store %arg10[%c0_24, %c0_25], %29 {strides = array<i32>} : memref<8x32xf32, #tpu.memory_space<vmem>>, vector<8x32xf32>,
    return
  }
  func.func @transform_0(%arg0: i32) -> (i32, i32) {
    %c0_i32 = arith.constant 0 : i32
    %c0_i32_0 = arith.constant 0 : i32
    return %arg0, %c0_i32 : i32, i32
  }
  func.func @transform_1(%arg0: i32) -> (i32, i32) {
    %c0_i32 = arith.constant 0 : i32
    %c0_i32_0 = arith.constant 0 : i32
    %c0_i32_1 = arith.constant 0 : i32
    return %c0_i32, %c0_i32_0 : i32, i32
  }
  func.func @transform_2(%arg0: i32) -> (i32, i32) {
    %c0_i32 = arith.constant 0 : i32
    %c0_i32_0 = arith.constant 0 : i32
    %c0_i32_1 = arith.constant 0 : i32
    return %c0_i32, %c0_i32_0 : i32, i32
  }
  func.func @transform_3(%arg0: i32) -> (i32, i32) {
    %c0_i32 = arith.constant 0 : i32
    %c0_i32_0 = arith.constant 0 : i32
    %c0_i32_1 = arith.constant 0 : i32
    return %c0_i32, %c0_i32_0 : i32, i32
  }
  func.func @transform_4(%arg0: i32) -> (i32, i32) {
    %c0_i32 = arith.constant 0 : i32
    %c0_i32_0 = arith.constant 0 : i32
    %c0_i32_1 = arith.constant 0 : i32
    return %c0_i32, %c0_i32_0 : i32, i32
  }
  func.func @transform_5(%arg0: i32) -> (i32, i32) {
    %c0_i32 = arith.constant 0 : i32
    %c0_i32_0 = arith.constant 0 : i32
    %c0_i32_1 = arith.constant 0 : i32
    return %c0_i32, %c0_i32_0 : i32, i32
  }
  func.func @transform_6(%arg0: i32) -> (i32, i32) {
    %c0_i32 = arith.constant 0 : i32
    %c0_i32_0 = arith.constant 0 : i32
    %c0_i32_1 = arith.constant 0 : i32
    return %c0_i32, %c0_i32_0 : i32, i32
  }
  func.func @transform_7(%arg0: i32) -> (i32, i32) {
    %c0_i32 = arith.constant 0 : i32
    %c0_i32_0 = arith.constant 0 : i32
    %c0_i32_1 = arith.constant 0 : i32
    return %c0_i32, %c0_i32_0 : i32, i32
  }
  func.func @transform_8(%arg0: i32) -> (i32, i32) {
    %c0_i32 = arith.constant 0 : i32
    %c0_i32_0 = arith.constant 0 : i32
    %c0_i32_1 = arith.constant 0 : i32
    return %c0_i32, %c0_i32_0 : i32, i32
  }
  func.func @transform_9(%arg0: i32) -> (i32, i32) {
    %c0_i32 = arith.constant 0 : i32
    %c0_i32_0 = arith.constant 0 : i32
    return %arg0, %c0_i32 : i32, i32
  }
  func.func @transform_10(%arg0: i32) -> (i32, i32) {
    %c0_i32 = arith.constant 0 : i32
    %c0_i32_0 = arith.constant 0 : i32
    return %arg0, %c0_i32 : i32, i32
  }
}

</mosaic_0001>

<bundles_post_ra>
// kernel: tpu_custom_call.1
= control target key start
LH: loop header
LB: loop body
LE: loop exit
PB: predicated region body
PF: predicated region fallthrough
CT: control target
= control target key end

     0   :  { %16 = vsyncpa [#allocation3], 0  ;;  %v595_v1 = vmov 0.0   ;;  %vm596_vm0 = vmmov 0   ;;  %vm62_vm1 = vcmask 261120   ;;  %s779_s0 = inlined_call_operand.vmem [shape: f32[8,32], index: 0, kind: input, shape index: {}]   ;;  %s780_s1 = inlined_call_operand.vmem [shape: bf16[32,128], index: 1, kind: input, shape index: {}]   ;;  %s781_s2 = inlined_call_operand.vmem [shape: f32[1,128], index: 2, kind: input, shape index: {}]   ;;  %s782_s3 = inlined_call_operand.vmem [shape: bf16[128,16], index: 3, kind: input, shape index: {}]   ;;  %s783_s4 = inlined_call_operand.vmem [shape: f32[1,16], index: 4, kind: input, shape index: {}]   ;;  %s784_s5 = inlined_call_operand.vmem [shape: bf16[16,128], index: 5, kind: input, shape index: {}]   ;;  %s785_s6 = inlined_call_operand.vmem [shape: f32[1,128], index: 6, kind: input, shape index: {}]   ;;  %s786_s7 = inlined_call_operand.vmem [shape: bf16[128,32], index: 7, kind: input, shape index: {}]   ;;  %s787_s8 = inlined_call_operand.vmem [shape: f32[1,32], index: 8, kind: input, shape index: {}]   ;;  %s788_s9 = inlined_call_operand.hbm [shape: f32[8,32], index: 9, kind: output, shape index: {0}]   ;;  %s789_s10 = inlined_call_operand.hbm [shape: f32[8,16], index: 10, kind: output, shape index: {1}]  }
   0x1   :  { %v528_v0 = vld [vmem:[%s780_s1] sm:$0xff]   ;;  %470 = vmatprep.subr.bf16.mxu1 %v595_v1  ;;  %v529_v2 = vld [vmem:[%s780_s1 + $0x8] sm:$0xff]   ;;  %498 = vmatprep.subr.bf16.mxu0 %v595_v1  ;;  %v532_v7 = vld [vmem:[%s782_s3 + $0x10] sm:$0xff]  }
   0x2   :  { %471 = vmatpush3.bf16.msra.mxu1 %v528_v0  ;;  %474 = vmatprep.mubr.msk.bf16.mxu1 %vm596_vm0, %v595_v1  ;;  %v37_v3 = vld [vmem:[%s779_s0] sm:$0xff]  ;;  %v531_v6 = vld [vmem:[%s782_s3 + $0x8] sm:$0xff]  }
   0x3   :  { %472 = vmatprep.subr.bf16.mxu1 %v595_v1  ;;  %500 = vmatprep.mubr.msk.bf16.mxu0 %vm596_vm0, %v595_v1  ;;  %v38_v4 = vpack.c.bf16 %v37_v3, %v37_v3  ;;  %v530_v5 = vld [vmem:[%s782_s3] sm:$0xff]  }
   0x6   :  { %473 = vmatpush3.bf16.msra.mxu1 %v529_v2 }
   0x7   :  { %478 = vmatprep.subr.bf16.mxu1 %v595_v1 }
   0x9   :  { %475 = vmatmul.mubr.msk.bf16.vlgmr.msra.gmra.mrb[0].mxu1 %vm62_vm1, %v38_v4 }
   0xa   :  { %479 = vmatpush3.bf16.msra.mxu1 %v530_v5  ;;  %494 = vmatprep.mubr.msk.bf16.mxu1 %vm596_vm0, %v595_v1 }
   0xb   :  { %480 = vmatprep.subr.bf16.mxu1 %v595_v1 }
   0xe   :  { %481 = vmatpush3.bf16.msra.mxu1 %v531_v6 }
   0xf   :  { %482 = vmatprep.subr.bf16.mxu1 %v595_v1 }
  0x10   :  { %17 = vsyncpa [#allocation5], 0  ;;  %v533_v8 = vld [vmem:[%s782_s3 + $0x18] sm:$0xff]   ;;  %v534_v9 = vld [vmem:[%s782_s3 + $0x20] sm:$0xff]   ;;  %vm219_vm2 = vcmask 130048   ;;  %s597_s11 = smov [#allocation4]  }
  0x11   :  { %v535_v10 = vld [vmem:[%s782_s3 + $0x28] sm:$0xff]   ;;  %v536_v11 = vld [vmem:[%s782_s3 + $0x30] sm:$0xff]   ;;  %v537_v12 = vld [vmem:[%s782_s3 + $0x38] sm:$0xff]   ;;  %s410_s12 = sshll.u32 %s597_s11, 4  ;;  %s411_s12 = int_to_ptr.vmem [resolvable:$true] %s410_s12 }
  0x12   :  { %483 = vmatpush3.bf16.msra.mxu1 %v532_v7  ;;  %v422_v13 = vld [vmem:[%s781_s2] ss:$0 sm:$0xff]  ;;  %v540_v30 = vld [vmem:[%s786_s7 + $0x8] sm:$0xff]   ;;  %v541_v31 = vld [vmem:[%s786_s7 + $0x10] sm:$0xff]   ;;  %s547_s13 = scalar_lea.vmem %s411_s12, 128  ;;  %p552_p1 = scmp.lt.s32.totalorder %s411_s12, %s411_s12 }
  0x13   :  { %484 = vmatprep.subr.bf16.mxu1 %v595_v1  ;;  %v538_v21 = vld [vmem:[%s784_s5] sm:$0xff]   ;;  %v542_v32 = vld [vmem:[%s786_s7 + $0x18] sm:$0xff]   ;;  %v544_v34 = vld [vmem:[%s786_s7 + $0x28] sm:$0xff]   ;;  %p548_p0 = scmp.ne.s32.totalorder %s411_s12, %s547_s13  ;;  %p553_p2 = scmp.lt.s32.totalorder %s547_s13, %s547_s13 }
  0x14   :  { %499 = vmatpush3.bf16.msra.mxu0 %v538_v21  ;;  %v426_v22 = vld [vmem:[%s783_s4] ss:$0 sm:$0xff]  ;;  %v545_v35 = vld [vmem:[%s786_s7 + $0x30] sm:$0xff]   ;;  %v546_v36 = vld [vmem:[%s786_s7 + $0x38] sm:$0xff]  }
  0x15   :  { %504 = vmatprep.subr.bf16.mxu0 %v595_v1  ;;  %v539_v27 = vld [vmem:[%s786_s7] sm:$0xff]   ;;  %p554_p3 = por %p553_p2, %p552_p1 }
  0x16   :  { %485 = vmatpush3.bf16.msra.mxu1 %v533_v8  ;;  %v543_v33 = vld [vmem:[%s786_s7 + $0x20] sm:$0xff]  }
  0x17   :  { %486 = vmatprep.subr.bf16.mxu1 %v595_v1  ;;  %v435_v37 = vld [vmem:[%s785_s6] ss:$0 sm:$0xff]  ;;  %p555_p4 = pnand %p554_p3, %p548_p0 }
  0x1a   :  { %487 = vmatpush3.bf16.msra.mxu1 %v534_v9 }
  0x1b   :  { %488 = vmatprep.subr.bf16.mxu1 %v595_v1 }
  0x1e   :  { %489 = vmatpush3.bf16.msra.mxu1 %v535_v10 }
  0x1f   :  { %490 = vmatprep.subr.bf16.mxu1 %v595_v1 }
  0x22   :  { %491 = vmatpush3.bf16.msra.mxu1 %v536_v11 }
  0x23   :  { %492 = vmatprep.subr.bf16.mxu1 %v595_v1 }
  0x26   :  { %493 = vmatpush3.bf16.msra.mxu1 %v537_v12 }
  0xdc   :  { %v100_v14 = vpop.f32.mrb[0].mxu1 }
  0xdd   :  { %v101_v15 = vadd.f32 %v422_v13, %v100_v14  ;;  %v476_v16 = vpop.f32.mrb[1].mxu1 }
  0xde   :  { %v103_v17 = vpop.f32.mrb[2].mxu1 }
  0xdf   :  { %v106_v18 = vmax.f32 %v101_v15, 0.0  ;;  %v477_v19 = vpop.f32.mrb[3].mxu1 }
  0xe1   :  { %v107_v20 = vpack.c.bf16 %v106_v18, %v106_v18 }
  0xe3   :  { %495 = vmatmul.mubr.bf16.vlgmr.msra.gmra.mrb[4].mxu1 %v107_v20 }
 0x1b6   :  { %v213_v23 = vpop.f32.mrb[4].mxu1 }
 0x1b7   :  { %v214_v24 = vadd.f32 %v426_v22, %v213_v23  ;;  %v496_v25 = vpop.f32.mrb[5].mxu1 }
 0x1b8   :  { %v216_v26 = vpop.f32.mrb[6].mxu1 }
 0x1b9   :  { %v221_v28 = vpack.c.bf16 %v214_v24, %v214_v24  ;;  %v497_v29 = vpop.f32.mrb[7].mxu1  ;;  %220 = vst.msk [vmem:[#allocation4] sm:$0xff] %vm219_vm2, %v214_v24 }
 0x1bb   :  { %501 = vmatmul.mubr.msk.bf16.vlgmr.msra.gmra.mrb[0].mxu0 %vm219_vm2, %v221_v28 }
 0x1bc   :  { %505 = vmatpush3.bf16.msra.mxu0 %v539_v27  ;;  %520 = vmatprep.mubr.msk.bf16.mxu0 %vm596_vm0, %v595_v1 }
 0x1bd   :  { %506 = vmatprep.subr.bf16.mxu0 %v595_v1 }
 0x1c0   :  { %507 = vmatpush3.bf16.msra.mxu0 %v540_v30 }
 0x1c1   :  { %508 = vmatprep.subr.bf16.mxu0 %v595_v1 }
 0x1c4   :  { %509 = vmatpush3.bf16.msra.mxu0 %v541_v31 }
 0x1c5   :  { %510 = vmatprep.subr.bf16.mxu0 %v595_v1 }
 0x1c8   :  { %511 = vmatpush3.bf16.msra.mxu0 %v542_v32 }
 0x1c9   :  { %512 = vmatprep.subr.bf16.mxu0 %v595_v1 }
 0x1cc   :  { %513 = vmatpush3.bf16.msra.mxu0 %v543_v33 }
 0x1cd   :  { %514 = vmatprep.subr.bf16.mxu0 %v595_v1 }
 0x1d0   :  { %515 = vmatpush3.bf16.msra.mxu0 %v544_v34 }
 0x1d1   :  { %516 = vmatprep.subr.bf16.mxu0 %v595_v1 }
 0x1d4   :  { %517 = vmatpush3.bf16.msra.mxu0 %v545_v35 }
 0x1d5   :  { %518 = vmatprep.subr.bf16.mxu0 %v595_v1 }
 0x1d8   :  { %519 = vmatpush3.bf16.msra.mxu0 %v546_v36 }
 0x28e   :  { %v274_v38 = vpop.f32.mrb[0].mxu0 }
 0x28f   :  { %v275_v39 = vadd.f32 %v435_v37, %v274_v38  ;;  %v502_v40 = vpop.f32.mrb[1].mxu0 }
 0x290   :  { %v277_v41 = vpop.f32.mrb[2].mxu0 }
 0x291   :  { %v280_v42 = vmax.f32 %v275_v39, 0.0  ;;  %v503_v43 = vpop.f32.mrb[3].mxu0 }
 0x293   :  { %v281_v44 = vpack.c.bf16 %v280_v42, %v280_v42 }
 0x295   :  { %521 = vmatmul.mubr.bf16.vlgmr.msra.gmra.mrb[4].mxu0 %v281_v44 }
 0x296   :  { %558 = shalt.err (!%p555_p4)
}
 0x297   :  { %s559_s14 = scalar_lea.hbm %s789_s10, 128 }
 0x298   :  { %p560_p5 = scmp.ne.s32.totalorder %s789_s10, %s559_s14  ;;  %p563_p6 = scmp.lt.u32.totalorder %s559_s14, %s789_s10 }
 0x29a   :  { %p565_p7 = pnand %p563_p6, %p560_p5 }
 0x29c   :  { %568 = shalt.err (!%p565_p7)
}
 0x29d   :  { %413 = dma.vmem_to_hbm [thread:$0]  %s411_s12, 128, %s789_s10, [#allocation5]   ;;  %v438_v45 = vld [vmem:[%s787_s8] ss:$0 sm:$0xff] }
 0x29e   :  { %s598_s4 = smov [#allocation2]  }
 0x29f   :  { %s400_s19 = sshll.u32 %s598_s4, 4  ;;  %s401_s19 = int_to_ptr.vmem [resolvable:$true] %s400_s19 }
 0x2a0   :  { %s569_s20 = scalar_lea.vmem %s401_s19, 128  ;;  %p574_p9 = scmp.lt.s32.totalorder %s401_s19, %s401_s19 }
 0x2a1   :  { %p570_p8 = scmp.ne.s32.totalorder %s401_s19, %s569_s20  ;;  %p575_p10 = scmp.lt.s32.totalorder %s569_s20, %s569_s20 }
 0x2a3   :  { %p576_p11 = por %p575_p10, %p574_p9 }
 0x2a5   :  { %p577_p12 = pnand %p576_p11, %p570_p8 }
 0x368   :  { %v387_v46 = vpop.f32.mrb[4].mxu0 }
 0x369   :  { %v388_v47 = vadd.f32 %v438_v45, %v387_v46  ;;  %v522_v48 = vpop.f32.mrb[5].mxu0 }
 0x36a   :  { %v390_v49 = vpop.f32.mrb[6].mxu0 }
 0x36b   :  { %393 = vst.msk [vmem:[#allocation2] sm:$0xff] %vm62_vm1, %v388_v47  ;;  %v523_v50 = vpop.f32.mrb[7].mxu0 }
 0x36c   :  { %580 = shalt.err (!%p577_p12)
}
 0x36d   :  { %s581_s8 = scalar_lea.hbm %s788_s9, 128 }
 0x36e   :  { %p582_p13 = scmp.ne.s32.totalorder %s788_s9, %s581_s8  ;;  %p585_p0 = scmp.lt.u32.totalorder %s581_s8, %s788_s9 }
 0x370   :  { %p587_p1 = pnand %p585_p0, %p582_p13 }
 0x372   :  { %590 = shalt.err (!%p587_p1)
}
 0x373   :  { %403 = dma.vmem_to_hbm [thread:$0]  %s401_s19, 128, %s788_s9, [#allocation3]  }
 0x374   :  { %591 = dma.done.wait [#allocation3], 128  }
 0x375   :  { %592 = vsyncadd [#allocation3], 4294967168 }
 0x376   :  { %593 = dma.done.wait [#allocation5], 128  }
 0x377   :  { %594 = vsyncadd [#allocation5], 4294967168 }
 0x378   :  { %420 = vsyncpa [#allocation3], 1 }
 0x379   :  { %421 = vsyncpa [#allocation5], 1 }

// kernel: tpu_custom_call.1
= control target key start
LH: loop header
LB: loop body
LE: loop exit
PB: predicated region body
PF: predicated region fallthrough
CT: control target
= control target key end

     0   :  { %16 = vsyncpa [#allocation3], 0  ;;  %v595_v1 = vmov 0.0   ;;  %vm596_vm0 = vmmov 0   ;;  %vm62_vm1 = vcmask 261120   ;;  %s779_s0 = inlined_call_operand.vmem [shape: f32[8,32], index: 0, kind: input, shape index: {}]   ;;  %s780_s1 = inlined_call_operand.vmem [shape: bf16[32,128], index: 1, kind: input, shape index: {}]   ;;  %s781_s2 = inlined_call_operand.vmem [shape: f32[1,128], index: 2, kind: input, shape index: {}]   ;;  %s782_s3 = inlined_call_operand.vmem [shape: bf16[128,16], index: 3, kind: input, shape index: {}]   ;;  %s783_s4 = inlined_call_operand.vmem [shape: f32[1,16], index: 4, kind: input, shape index: {}]   ;;  %s784_s5 = inlined_call_operand.vmem [shape: bf16[16,128], index: 5, kind: input, shape index: {}]   ;;  %s785_s6 = inlined_call_operand.vmem [shape: f32[1,128], index: 6, kind: input, shape index: {}]   ;;  %s786_s7 = inlined_call_operand.vmem [shape: bf16[128,32], index: 7, kind: input, shape index: {}]   ;;  %s787_s8 = inlined_call_operand.vmem [shape: f32[1,32], index: 8, kind: input, shape index: {}]   ;;  %s788_s9 = inlined_call_operand.hbm [shape: f32[8,32], index: 9, kind: output, shape index: {0}]   ;;  %s789_s10 = inlined_call_operand.hbm [shape: f32[8,16], index: 10, kind: output, shape index: {1}]  }
   0x1   :  { %v528_v0 = vld [vmem:[%s780_s1] sm:$0xff]   ;;  %470 = vmatprep.subr.bf16.mxu1 %v595_v1  ;;  %v529_v2 = vld [vmem:[%s780_s1 + $0x8] sm:$0xff]   ;;  %498 = vmatprep.subr.bf16.mxu0 %v595_v1  ;;  %v532_v7 = vld [vmem:[%s782_s3 + $0x10] sm:$0xff]  }
   0x2   :  { %471 = vmatpush3.bf16.msra.mxu1 %v528_v0  ;;  %474 = vmatprep.mubr.msk.bf16.mxu1 %vm596_vm0, %v595_v1  ;;  %v37_v3 = vld [vmem:[%s779_s0] sm:$0xff]  ;;  %v531_v6 = vld [vmem:[%s782_s3 + $0x8] sm:$0xff]  }
   0x3   :  { %472 = vmatprep.subr.bf16.mxu1 %v595_v1  ;;  %500 = vmatprep.mubr.msk.bf16.mxu0 %vm596_vm0, %v595_v1  ;;  %v38_v4 = vpack.c.bf16 %v37_v3, %v37_v3  ;;  %v530_v5 = vld [vmem:[%s782_s3] sm:$0xff]  }
   0x6   :  { %473 = vmatpush3.bf16.msra.mxu1 %v529_v2 }
   0x7   :  { %478 = vmatprep.subr.bf16.mxu1 %v595_v1 }
   0x9   :  { %475 = vmatmul.mubr.msk.bf16.vlgmr.msra.gmra.mrb[0].mxu1 %vm62_vm1, %v38_v4 }
   0xa   :  { %479 = vmatpush3.bf16.msra.mxu1 %v530_v5  ;;  %494 = vmatprep.mubr.msk.bf16.mxu1 %vm596_vm0, %v595_v1 }
   0xb   :  { %480 = vmatprep.subr.bf16.mxu1 %v595_v1 }
   0xe   :  { %481 = vmatpush3.bf16.msra.mxu1 %v531_v6 }
   0xf   :  { %482 = vmatprep.subr.bf16.mxu1 %v595_v1 }
  0x10   :  { %17 = vsyncpa [#allocation5], 0  ;;  %v533_v8 = vld [vmem:[%s782_s3 + $0x18] sm:$0xff]   ;;  %v534_v9 = vld [vmem:[%s782_s3 + $0x20] sm:$0xff]   ;;  %vm219_vm2 = vcmask 130048   ;;  %s597_s11 = smov [#allocation4]  }
  0x11   :  { %v535_v10 = vld [vmem:[%s782_s3 + $0x28] sm:$0xff]   ;;  %v536_v11 = vld [vmem:[%s782_s3 + $0x30] sm:$0xff]   ;;  %v537_v12 = vld [vmem:[%s782_s3 + $0x38] sm:$0xff]   ;;  %s410_s12 = sshll.u32 %s597_s11, 4  ;;  %s411_s12 = int_to_ptr.vmem [resolvable:$true] %s410_s12 }
  0x12   :  { %483 = vmatpush3.bf16.msra.mxu1 %v532_v7  ;;  %v422_v13 = vld [vmem:[%s781_s2] ss:$0 sm:$0xff]  ;;  %v540_v30 = vld [vmem:[%s786_s7 + $0x8] sm:$0xff]   ;;  %v541_v31 = vld [vmem:[%s786_s7 + $0x10] sm:$0xff]   ;;  %s547_s13 = scalar_lea.vmem %s411_s12, 128  ;;  %p552_p1 = scmp.lt.s32.totalorder %s411_s12, %s411_s12 }
  0x13   :  { %484 = vmatprep.subr.bf16.mxu1 %v595_v1  ;;  %v538_v21 = vld [vmem:[%s784_s5] sm:$0xff]   ;;  %v542_v32 = vld [vmem:[%s786_s7 + $0x18] sm:$0xff]   ;;  %v544_v34 = vld [vmem:[%s786_s7 + $0x28] sm:$0xff]   ;;  %p548_p0 = scmp.ne.s32.totalorder %s411_s12, %s547_s13  ;;  %p553_p2 = scmp.lt.s32.totalorder %s547_s13, %s547_s13 }
  0x14   :  { %499 = vmatpush3.bf16.msra.mxu0 %v538_v21  ;;  %v426_v22 = vld [vmem:[%s783_s4] ss:$0 sm:$0xff]  ;;  %v545_v35 = vld [vmem:[%s786_s7 + $0x30] sm:$0xff]   ;;  %v546_v36 = vld [vmem:[%s786_s7 + $0x38] sm:$0xff]  }
  0x15   :  { %504 = vmatprep.subr.bf16.mxu0 %v595_v1  ;;  %v539_v27 = vld [vmem:[%s786_s7] sm:$0xff]   ;;  %p554_p3 = por %p553_p2, %p552_p1 }
  0x16   :  { %485 = vmatpush3.bf16.msra.mxu1 %v533_v8  ;;  %v543_v33 = vld [vmem:[%s786_s7 + $0x20] sm:$0xff]  }
  0x17   :  { %486 = vmatprep.subr.bf16.mxu1 %v595_v1  ;;  %v435_v37 = vld [vmem:[%s785_s6] ss:$0 sm:$0xff]  ;;  %p555_p4 = pnand %p554_p3, %p548_p0 }
  0x1a   :  { %487 = vmatpush3.bf16.msra.mxu1 %v534_v9 }
  0x1b   :  { %488 = vmatprep.subr.bf16.mxu1 %v595_v1 }
  0x1e   :  { %489 = vmatpush3.bf16.msra.mxu1 %v535_v10 }
  0x1f   :  { %490 = vmatprep.subr.bf16.mxu1 %v595_v1 }
  0x22   :  { %491 = vmatpush3.bf16.msra.mxu1 %v536_v11 }
  0x23   :  { %492 = vmatprep.subr.bf16.mxu1 %v595_v1 }
  0x26   :  { %493 = vmatpush3.bf16.msra.mxu1 %v537_v12 }
  0xdc   :  { %v100_v14 = vpop.f32.mrb[0].mxu1 }
  0xdd   :  { %v101_v15 = vadd.f32 %v422_v13, %v100_v14  ;;  %v476_v16 = vpop.f32.mrb[1].mxu1 }
  0xde   :  { %v103_v17 = vpop.f32.mrb[2].mxu1 }
  0xdf   :  { %v106_v18 = vmax.f32 %v101_v15, 0.0  ;;  %v477_v19 = vpop.f32.mrb[3].mxu1 }
  0xe1   :  { %v107_v20 = vpack.c.bf16 %v106_v18, %v106_v18 }
  0xe3   :  { %495 = vmatmul.mubr.bf16.vlgmr.msra.gmra.mrb[4].mxu1 %v107_v20 }
 0x1b6   :  { %v213_v23 = vpop.f32.mrb[4].mxu1 }
 0x1b7   :  { %v214_v24 = vadd.f32 %v426_v22, %v213_v23  ;;  %v496_v25 = vpop.f32.mrb[5].mxu1 }
 0x1b8   :  { %v216_v26 = vpop.f32.mrb[6].mxu1 }
 0x1b9   :  { %v221_v28 = vpack.c.bf16 %v214_v24, %v214_v24  ;;  %v497_v29 = vpop.f32.mrb[7].mxu1  ;;  %220 = vst.msk [vmem:[#allocation4] sm:$0xff] %vm219_vm2, %v214_v24 }
 0x1bb   :  { %501 = vmatmul.mubr.msk.bf16.vlgmr.msra.gmra.mrb[0].mxu0 %vm219_vm2, %v221_v28 }
 0x1bc   :  { %505 = vmatpush3.bf16.msra.mxu0 %v539_v27  ;;  %520 = vmatprep.mubr.msk.bf16.mxu0 %vm596_vm0, %v595_v1 }
 0x1bd   :  { %506 = vmatprep.subr.bf16.mxu0 %v595_v1 }
 0x1c0   :  { %507 = vmatpush3.bf16.msra.mxu0 %v540_v30 }
 0x1c1   :  { %508 = vmatprep.subr.bf16.mxu0 %v595_v1 }
 0x1c4   :  { %509 = vmatpush3.bf16.msra.mxu0 %v541_v31 }
 0x1c5   :  { %510 = vmatprep.subr.bf16.mxu0 %v595_v1 }
 0x1c8   :  { %511 = vmatpush3.bf16.msra.mxu0 %v542_v32 }
 0x1c9   :  { %512 = vmatprep.subr.bf16.mxu0 %v595_v1 }
 0x1cc   :  { %513 = vmatpush3.bf16.msra.mxu0 %v543_v33 }
 0x1cd   :  { %514 = vmatprep.subr.bf16.mxu0 %v595_v1 }
 0x1d0   :  { %515 = vmatpush3.bf16.msra.mxu0 %v544_v34 }
 0x1d1   :  { %516 = vmatprep.subr.bf16.mxu0 %v595_v1 }
 0x1d4   :  { %517 = vmatpush3.bf16.msra.mxu0 %v545_v35 }
 0x1d5   :  { %518 = vmatprep.subr.bf16.mxu0 %v595_v1 }
 0x1d8   :  { %519 = vmatpush3.bf16.msra.mxu0 %v546_v36 }
 0x28e   :  { %v274_v38 = vpop.f32.mrb[0].mxu0 }
 0x28f   :  { %v275_v39 = vadd.f32 %v435_v37, %v274_v38  ;;  %v502_v40 = vpop.f32.mrb[1].mxu0 }
 0x290   :  { %v277_v41 = vpop.f32.mrb[2].mxu0 }
 0x291   :  { %v280_v42 = vmax.f32 %v275_v39, 0.0  ;;  %v503_v43 = vpop.f32.mrb[3].mxu0 }
 0x293   :  { %v281_v44 = vpack.c.bf16 %v280_v42, %v280_v42 }
 0x295   :  { %521 = vmatmul.mubr.bf16.vlgmr.msra.gmra.mrb[4].mxu0 %v281_v44 }
 0x296   :  { %558 = shalt.err (!%p555_p4)
}
 0x297   :  { %s559_s14 = scalar_lea.hbm %s789_s10, 128 }
 0x298   :  { %p560_p5 = scmp.ne.s32.totalorder %s789_s10, %s559_s14  ;;  %p563_p6 = scmp.lt.u32.totalorder %s559_s14, %s789_s10 }
 0x29a   :  { %p565_p7 = pnand %p563_p6, %p560_p5 }
 0x29c   :  { %568 = shalt.err (!%p565_p7)
}
 0x29d   :  { %413 = dma.vmem_to_hbm [thread:$0]  %s411_s12, 128, %s789_s10, [#allocation5]   ;;  %v438_v45 = vld [vmem:[%s787_s8] ss:$0 sm:$0xff] }
 0x29e   :  { %s598_s4 = smov [#allocation2]  }
 0x29f   :  { %s400_s19 = sshll.u32 %s598_s4, 4  ;;  %s401_s19 = int_to_ptr.vmem [resolvable:$true] %s400_s19 }
 0x2a0   :  { %s569_s20 = scalar_lea.vmem %s401_s19, 128  ;;  %p574_p9 = scmp.lt.s32.totalorder %s401_s19, %s401_s19 }
 0x2a1   :  { %p570_p8 = scmp.ne.s32.totalorder %s401_s19, %s569_s20  ;;  %p575_p10 = scmp.lt.s32.totalorder %s569_s20, %s569_s20 }
 0x2a3   :  { %p576_p11 = por %p575_p10, %p574_p9 }
 0x2a5   :  { %p577_p12 = pnand %p576_p11, %p570_p8 }
 0x368   :  { %v387_v46 = vpop.f32.mrb[4].mxu0 }
 0x369   :  { %v388_v47 = vadd.f32 %v438_v45, %v387_v46  ;;  %v522_v48 = vpop.f32.mrb[5].mxu0 }
 0x36a   :  { %v390_v49 = vpop.f32.mrb[6].mxu0 }
 0x36b   :  { %393 = vst.msk [vmem:[#allocation2] sm:$0xff] %vm62_vm1, %v388_v47  ;;  %v523_v50 = vpop.f32.mrb[7].mxu0 }
 0x36c   :  { %580 = shalt.err (!%p577_p12)
}
 0x36d   :  { %s581_s8 = scalar_lea.hbm %s788_s9, 128 }
 0x36e   :  { %p582_p13 = scmp.ne.s32.totalorder %s788_s9, %s581_s8  ;;  %p585_p0 = scmp.lt.u32.totalorder %s581_s8, %s788_s9 }
 0x370   :  { %p587_p1 = pnand %p585_p0, %p582_p13 }
 0x372   :  { %590 = shalt.err (!%p587_p1)
}
 0x373   :  { %403 = dma.vmem_to_hbm [thread:$0]  %s401_s19, 128, %s788_s9, [#allocation3]  }
 0x374   :  { %591 = dma.done.wait [#allocation3], 128  }
 0x375   :  { %592 = vsyncadd [#allocation3], 4294967168 }
 0x376   :  { %593 = dma.done.wait [#allocation5], 128  }
 0x377   :  { %594 = vsyncadd [#allocation5], 4294967168 }
 0x378   :  { %420 = vsyncpa [#allocation3], 1 }
 0x379   :  { %421 = vsyncpa [#allocation5], 1 }

</bundles_post_ra>
